<compile_context>
chip_gen: v7x
topology: tpu7x:2x2x1
jax: 0.10.0
libtpu: 0.0.40
codegen_flags: <defaults>
</compile_context>

<pallas_src>
import jax
import jax.numpy as jnp
from jax.experimental import pallas as pl
from jax.experimental.pallas import tpu as pltpu

EPS = 1e-5


def _bn1d_train_kernel(x_ref, gamma_ref, beta_ref, o_ref):
    # x_ref / o_ref: (C, N) lane-dense VMEM blocks (C == 1 for BatchNorm1d(1)).
    # gamma_ref / beta_ref: (1,) f32 scalars in SMEM.
    x = x_ref[...].astype(jnp.float32)                               # (C, N)
    n = x.shape[-1]
    inv_n = 1.0 / n
    mean = jnp.sum(x, axis=-1, keepdims=True) * inv_n                # (C, 1)
    diff = x - mean
    var = jnp.sum(diff * diff, axis=-1, keepdims=True) * inv_n       # biased
    inv_std = jax.lax.rsqrt(var + EPS)                               # (C, 1)
    scale = gamma_ref[0] * inv_std                                   # (C, 1)
    bias = beta_ref[0] - mean * scale                                # (C, 1)
    o_ref[...] = (x * scale + bias).astype(o_ref.dtype)


def single_bn_model_forward(imgs, gamma, beta):
    """Pallas implementation of SingleBNModel.forward (training-mode BN1d(1))."""
    N, C = imgs.shape
    assert C == 1, "SingleBNModel uses nn.BatchNorm1d(1) (num_features == 1)"
    # Lane-dense layout: (N, 1) -> (1, N). Free reshape since C == 1.
    x_cn = imgs.reshape(C, N)
    gamma1d = gamma.reshape(C).astype(jnp.float32)
    beta1d = beta.reshape(C).astype(jnp.float32)
    out_cn = pl.pallas_call(
        _bn1d_train_kernel,
        out_shape=jax.ShapeDtypeStruct((C, N), imgs.dtype),
        in_specs=[
            pl.BlockSpec(memory_space=pltpu.MemorySpace.VMEM),   # x, whole array
            pl.BlockSpec(memory_space=pltpu.MemorySpace.SMEM),   # gamma scalar
            pl.BlockSpec(memory_space=pltpu.MemorySpace.SMEM),   # beta scalar
        ],
        out_specs=pl.BlockSpec(memory_space=pltpu.MemorySpace.VMEM),
    )(x_cn, gamma1d, beta1d)
    return out_cn.reshape(N, C)


if __name__ == "__main__":
    key = jax.random.PRNGKey(0)
    k_x, k_g, k_b = jax.random.split(key, 3)

    N, C = 16, 1  # BatchNorm1d(1): num_features = 1
    imgs = jax.random.normal(k_x, (N, C), dtype=jnp.float32)

    # Deterministic parameter init.  PyTorch default is gamma=1, beta=0; use
    # small random perturbations so the affine transform is exercised.
    gamma = 1.0 + 0.1 * jax.random.normal(k_g, (C,), dtype=jnp.float32)
    beta = 0.1 * jax.random.normal(k_b, (C,), dtype=jnp.float32)

    out = single_bn_model_forward(imgs, gamma, beta)
    out = jax.block_until_ready(out)

    # Pure-JAX reference (training-mode BatchNorm1d semantics, biased variance).
    mean = jnp.mean(imgs, axis=0, keepdims=True)
    var = jnp.mean((imgs - mean) ** 2, axis=0, keepdims=True)
    ref = (imgs - mean) / jnp.sqrt(var + EPS) * gamma.reshape(1, C) + beta.reshape(1, C)
    assert jnp.allclose(out, ref, atol=1e-5, rtol=1e-5), "mismatch vs reference"

    print("KERNEL_OK")
</pallas_src>

<mosaic_0001>
module attributes {stable_mosaic.version = 11 : i64} {
  func.func @_bn1d_train_kernel(%arg0: memref<1x16xf32, #tpu.memory_space<vmem>>, %arg1: memref<1xf32, #tpu.memory_space<smem>>, %arg2: memref<1xf32, #tpu.memory_space<smem>>, %arg3: memref<1x16xf32, #tpu.memory_space<vmem>>) attributes {dimension_semantics = [], scalar_prefetch = 0 : i64, scratch_operands = 0 : i64, tpu.core_type = #tpu.core_type<tc>} {
    %c0 = arith.constant 0 : index
    %c0_0 = arith.constant 0 : index
    %0 = vector.load %arg0[%c0, %c0_0] : memref<1x16xf32, #tpu.memory_space<vmem>>, vector<1x16xf32>
    %cst = arith.constant dense<0.000000e+00> : vector<1xf32>
    %1 = vector.multi_reduction <add>, %0, %cst [1] : vector<1x16xf32> to vector<1xf32>
    %2 = vector.shape_cast %1 : vector<1xf32> to vector<1x1xf32>
    %cst_1 = arith.constant 6.250000e-02 : f32
    %3 = vector.broadcast %cst_1 : f32 to vector<1x1xf32>
    %4 = arith.mulf %2, %3 : vector<1x1xf32>
    %5 = vector.broadcast %4 : vector<1x1xf32> to vector<1x16xf32>
    %6 = arith.subf %0, %5 : vector<1x16xf32>
    %7 = arith.mulf %6, %6 : vector<1x16xf32>
    %cst_2 = arith.constant dense<0.000000e+00> : vector<1xf32>
    %8 = vector.multi_reduction <add>, %7, %cst_2 [1] : vector<1x16xf32> to vector<1xf32>
    %9 = vector.shape_cast %8 : vector<1xf32> to vector<1x1xf32>
    %cst_3 = arith.constant 6.250000e-02 : f32
    %10 = vector.broadcast %cst_3 : f32 to vector<1x1xf32>
    %11 = arith.mulf %9, %10 : vector<1x1xf32>
    %cst_4 = arith.constant 9.99999974E-6 : f32
    %12 = vector.broadcast %cst_4 : f32 to vector<1x1xf32>
    %13 = arith.addf %11, %12 : vector<1x1xf32>
    %14 = math.rsqrt %13 : vector<1x1xf32>
    %c0_5 = arith.constant 0 : index
    %15 = memref.load %arg1[%c0_5] : memref<1xf32, #tpu.memory_space<smem>>
    %16 = vector.broadcast %15 : f32 to vector<1x1xf32>
    %17 = arith.mulf %16, %14 : vector<1x1xf32>
    %c0_6 = arith.constant 0 : index
    %18 = memref.load %arg2[%c0_6] : memref<1xf32, #tpu.memory_space<smem>>
    %19 = arith.mulf %4, %17 : vector<1x1xf32>
    %20 = vector.broadcast %18 : f32 to vector<1x1xf32>
    %21 = arith.subf %20, %19 : vector<1x1xf32>
    %22 = vector.broadcast %17 : vector<1x1xf32> to vector<1x16xf32>
    %23 = arith.mulf %0, %22 : vector<1x16xf32>
    %24 = vector.broadcast %21 : vector<1x1xf32> to vector<1x16xf32>
    %25 = arith.addf %23, %24 : vector<1x16xf32>
    %c0_7 = arith.constant 0 : index
    %c0_8 = arith.constant 0 : index
    %26 = vector.load %arg3[%c0_7, %c0_8] : memref<1x16xf32, #tpu.memory_space<vmem>>, vector<1x16xf32>
    tpu.vector_store %arg3[%c0_7, %c0_8], %25 {strides = array<i32>} : memref<1x16xf32, #tpu.memory_space<vmem>>, vector<1x16xf32>,
    return
  }
}

</mosaic_0001>

<bundles_post_ra>
// kernel: tpu_custom_call.1
= control target key start
LH: loop header
LB: loop body
LE: loop exit
PB: predicated region body
PF: predicated region fallthrough
CT: control target
= control target key end

     0   :  { %vm18_vm0 = vcmask 122880   ;;  %s127_s0 = inlined_call_operand.vmem [shape: f32[1,16], index: 0, kind: input, shape index: {}]   ;;  %s128_s1 = inlined_call_operand.<no memory space> [shape: f32[1], index: 1, kind: input, shape index: {}]   ;;  %s129_s2 = inlined_call_operand.<no memory space> [shape: f32[1], index: 2, kind: input, shape index: {}]   ;;  %s130_s3 = inlined_call_operand.hbm [shape: f32[1,16], index: 3, kind: output, shape index: {}]  }
   0x1   :  { %v17_v0 = vld [vmem:[%s127_s0] sm:$0x1] }
   0x2   :  { %10 = vsyncpa [#allocation5], 0  ;;  %v19_v1 = vsel %vm18_vm0, %v17_v0, 0.0  ;;  %v32_v10 = vstv %s128_s1  ;;  %v36_v13 = vstv %s129_s2  ;;  %s82_s17 = smov [#allocation4]  }
   0x3   :  { %20 = vadd.xlane.f32.xlu0 %v19_v1  ;;  %s47_s18 = sshll.u32 %s82_s17, 4  ;;  %s48_s18 = int_to_ptr.vmem [resolvable:$true] %s47_s18 }
   0x4   :  { %s58_s19 = scalar_lea.vmem %s48_s18, 16  ;;  %s62_s20 = scalar_lea.vmem %s48_s18, 32 }
   0x5   :  { %p59_p0 = scmp.ne.s32.totalorder %s48_s18, %s58_s19  ;;  %p63_p1 = scmp.lt.s32.totalorder %s48_s18, %s48_s18 }
   0x6   :  { %p64_p2 = scmp.lt.s32.totalorder %s62_s20, %s58_s19 }
   0x8   :  { %p65_p3 = por %p64_p2, %p63_p1 }
   0xa   :  { %p66_p4 = pnand %p65_p3, %p59_p0 }
  0x90   :  { %v21_v2 = vpop.xlane.xlu0 %20 }
  0x91   :  { %v22_v3 = vmul.f32 0.0625, %v21_v2 }
  0x93   :  { %v23_v4 = vsub.f32 %v17_v0, %v22_v3 }
  0x95   :  { %v24_v5 = vmul.f32 %v23_v4, %v23_v4 }
  0x97   :  { %v25_v6 = vsel %vm18_vm0, %v24_v5, 0.0 }
  0x98   :  { %26 = vadd.xlane.f32.xlu0 %v25_v6 }
 0x125   :  { %v27_v7 = vpop.xlane.xlu0 %26 }
 0x126   :  { %v28_v8 = vmul.f32 0.0625, %v27_v7 }
 0x128   :  { %v29_v9 = vadd.f32 1e-05, %v28_v8 }
 0x12a   :  { %56 = vrsqrt.f32 %v29_v9 }
 0x134   :  { %v57_v11 = vpop.eup %56 }
 0x135   :  { %v33_v12 = vmul.f32 %v57_v11, %v32_v10 }
 0x137   :  { %v35_v14 = vmul.f32 %v33_v12, %v22_v3  ;;  %v38_v16 = vmul.f32 %v33_v12, %v17_v0 }
 0x139   :  { %v37_v15 = vsub.f32 %v36_v13, %v35_v14 }
 0x13b   :  { %v39_v17 = vadd.f32 %v38_v16, %v37_v15 }
 0x13d   :  { %40 = vst.msk [vmem:[#allocation4] sm:$0x1] %vm18_vm0, %v39_v17 }
 0x13e   :  { %69 = shalt.err (!%p66_p4)
}
 0x13f   :  { %s70_s2 = scalar_lea.hbm %s130_s3, 16 }
 0x140   :  { %p71_p5 = scmp.ne.s32.totalorder %s130_s3, %s70_s2  ;;  %p74_p6 = scmp.lt.u32.totalorder %s70_s2, %s130_s3 }
 0x142   :  { %p76_p7 = pnand %p74_p6, %p71_p5 }
 0x144   :  { %79 = shalt.err (!%p76_p7)
}
 0x145   :  { %50 = dma.vmem_to_hbm [thread:$0]  %s48_s18, 16, %s130_s3, [#allocation5]  }
 0x146   :  { %80 = dma.done.wait [#allocation5], 16  }
 0x147   :  { %81 = vsyncadd [#allocation5], 4294967280 }
 0x148   :  { %54 = vsyncpa [#allocation5], 1 }

</bundles_post_ra>
